<compile_context>
chip_gen: v7x
topology: tpu7x:2x2x1
jax: 0.10.0
libtpu: 0.0.40
codegen_flags: <defaults>
</compile_context>

<pallas_src>
import functools

import jax
import jax.numpy as jnp
from jax.experimental import pallas as pl
from jax.experimental.pallas import tpu as pltpu

IN_F = 2      # nn.Linear(2, 10)
HIDDEN = 10
OUT_F = 1     # nn.Linear(10, 1)


def mlp_kernel(w1_ref, b1_ref, w2_ref, b2_ref, x_ref, o_ref):
    # x_ref: (2, Btile) in VMEM, batch on the lane axis.
    # w1_ref (10, 2), b1_ref (10,), w2_ref (1, 10), b2_ref (1,) in SMEM.
    x0 = x_ref[0:1, :]                       # (1, Btile)
    x1 = x_ref[1:2, :]                       # (1, Btile)
    acc = jnp.zeros_like(x0)                 # (1, Btile) f32 accumulator
    # Hidden dim is only 10: fully unroll. Each step is a few vector-scalar
    # FMAs + a max on the VPU; weights/biases are cheap SMEM scalar reads.
    for j in range(HIDDEN):
        h_j = x0 * w1_ref[j, 0] + x1 * w1_ref[j, 1] + b1_ref[j]   # Linear(2->10), row j
        h_j = jnp.maximum(h_j, 0.0)                               # ReLU
        acc = acc + h_j * w2_ref[0, j]                            # Linear(10->1) contraction
    y = acc + b2_ref[0]
    o_ref[...] = jax.nn.sigmoid(y)           # Sigmoid on the EUP, f32 throughout


def _round_up(n, m):
    return ((n + m - 1) // m) * m


@functools.partial(jax.jit, static_argnames=("block_b",))
def simple_mlp_forward(x, w1, b1, w2, b2, *, block_b=8192):
    """x: (B, 2) f32; params in PyTorch layout: w1 (10, 2), b1 (10,),
    w2 (1, 10), b2 (1,). Returns (B, 1) f32 = sigmoid(relu(x@w1.T+b1)@w2.T+b2)."""
    B = x.shape[0]
    # Lane-dense batch tile: multiple of 128, large enough to amortize the
    # ~0.35 us per-step overhead. Tile VMEM is tiny (8*Btile bytes for x),
    # so VMEM limits are a non-issue on v5e/v6e/v7x alike.
    bt = min(block_b, _round_up(max(B, 1), 128))
    bp = _round_up(B, bt)

    # Layout plumbing in the wrapper (fused by XLA): pad batch, put it on lanes.
    x_t = jnp.pad(x, ((0, bp - B), (0, 0))).T       # (2, Bp)

    smem = pl.BlockSpec(memory_space=pltpu.MemorySpace.SMEM)
    out = pl.pallas_call(
        mlp_kernel,
        out_shape=jax.ShapeDtypeStruct((OUT_F, bp), jnp.float32),
        grid=(bp // bt,),
        in_specs=[
            smem,                                         # w1 (10, 2)  - resident params
            smem,                                         # b1 (10,)
            smem,                                         # w2 (1, 10)
            smem,                                         # b2 (1,)
            pl.BlockSpec((IN_F, bt), lambda i: (0, i)),   # x: streamed (2, Btile) tiles
        ],
        out_specs=pl.BlockSpec((OUT_F, bt), lambda i: (0, i)),  # lane-dense (1, Btile) output
        compiler_params=pltpu.CompilerParams(
            dimension_semantics=("parallel",),            # batch tiles independent (v7x 2 TCs)
        ),
    )(w1, b1, w2, b2, x_t)

    return out[0, :B].reshape(B, OUT_F)


def init_params(key):
    """Deterministic init mimicking PyTorch's default Linear init
    (uniform in +-1/sqrt(fan_in)), kept in PyTorch weight layout."""
    k1, k2, k3, k4 = jax.random.split(key, 4)
    bound1 = 1.0 / jnp.sqrt(2.0)
    bound2 = 1.0 / jnp.sqrt(10.0)
    w1 = jax.random.uniform(k1, (HIDDEN, IN_F), jnp.float32, -bound1, bound1)
    b1 = jax.random.uniform(k2, (HIDDEN,), jnp.float32, -bound1, bound1)
    w2 = jax.random.uniform(k3, (OUT_F, HIDDEN), jnp.float32, -bound2, bound2)
    b2 = jax.random.uniform(k4, (OUT_F,), jnp.float32, -bound2, bound2)
    return w1, b1, w2, b2


if __name__ == "__main__":
    key = jax.random.PRNGKey(0)
    k_x, k_p, k_x2 = jax.random.split(key, 3)

    w1, b1, w2, b2 = init_params(k_p)

    def ref_fn(xx):
        h = jnp.maximum(xx @ w1.T + b1, 0.0)
        return jax.nn.sigmoid(h @ w2.T + b2)

    # Small shape consistent with the module: batch=8, in_features=2.
    x = jax.random.normal(k_x, (8, IN_F), jnp.float32)
    out = jax.block_until_ready(simple_mlp_forward(x, w1, b1, w2, b2))
    assert out.shape == (8, OUT_F)
    assert jnp.allclose(out, ref_fn(x), atol=1e-5), "mismatch vs reference (batch=8)"

    # Exercise the multi-tile streaming path: batch=300, 128-wide batch tiles
    # -> grid of 3 tiles with padding of the ragged tail.
    x2 = jax.random.normal(k_x2, (300, IN_F), jnp.float32)
    out2 = jax.block_until_ready(
        simple_mlp_forward(x2, w1, b1, w2, b2, block_b=128))
    assert out2.shape == (300, OUT_F)
    assert jnp.allclose(out2, ref_fn(x2), atol=1e-5), "mismatch vs reference (batch=300)"

    print("KERNEL_OK")
</pallas_src>

<mosaic_0001>
module attributes {stable_mosaic.version = 11 : i64} {
  func.func @mlp_kernel(%arg0: i32, %arg1: memref<10x2xf32, #tpu.memory_space<smem>>, %arg2: memref<10xf32, #tpu.memory_space<smem>>, %arg3: memref<1x10xf32, #tpu.memory_space<smem>>, %arg4: memref<1xf32, #tpu.memory_space<smem>>, %arg5: memref<2x128xf32, #tpu.memory_space<vmem>>, %arg6: memref<1x128xf32, #tpu.memory_space<vmem>>) attributes {dimension_semantics = [#tpu.dimension_semantics<parallel>], iteration_bounds = array<i64: 1>, scalar_prefetch = 0 : i64, scratch_operands = 0 : i64, tpu.core_type = #tpu.core_type<tc>, window_params = [{transform_indices = @transform_0, window_bounds = array<i64: 10, 2>}, {transform_indices = @transform_1, window_bounds = array<i64: 10>}, {transform_indices = @transform_2, window_bounds = array<i64: 1, 10>}, {transform_indices = @transform_3, window_bounds = array<i64: 1>}, {transform_indices = @transform_4, window_bounds = array<i64: 2, 128>}, {transform_indices = @transform_5, window_bounds = array<i64: 1, 128>}]} {
    %c0 = arith.constant 0 : index
    %c0_0 = arith.constant 0 : index
    %0 = vector.load %arg5[%c0, %c0_0] : memref<2x128xf32, #tpu.memory_space<vmem>>, vector<1x128xf32>
    %c1 = arith.constant 1 : index
    %c0_1 = arith.constant 0 : index
    %1 = vector.load %arg5[%c1, %c0_1] : memref<2x128xf32, #tpu.memory_space<vmem>>, vector<1x128xf32>
    %cst = arith.constant 0.000000e+00 : f32
    %2 = vector.broadcast %cst : f32 to vector<1x128xf32>
    %c0_2 = arith.constant 0 : index
    %c0_3 = arith.constant 0 : index
    %3 = memref.load %arg1[%c0_2, %c0_3] : memref<10x2xf32, #tpu.memory_space<smem>>
    %4 = vector.broadcast %3 : f32 to vector<1x128xf32>
    %5 = arith.mulf %0, %4 : vector<1x128xf32>
    %c0_4 = arith.constant 0 : index
    %c1_5 = arith.constant 1 : index
    %6 = memref.load %arg1[%c0_4, %c1_5] : memref<10x2xf32, #tpu.memory_space<smem>>
    %7 = vector.broadcast %6 : f32 to vector<1x128xf32>
    %8 = arith.mulf %1, %7 : vector<1x128xf32>
    %9 = arith.addf %5, %8 : vector<1x128xf32>
    %c0_6 = arith.constant 0 : index
    %10 = memref.load %arg2[%c0_6] : memref<10xf32, #tpu.memory_space<smem>>
    %11 = vector.broadcast %10 : f32 to vector<1x128xf32>
    %12 = arith.addf %9, %11 : vector<1x128xf32>
    %cst_7 = arith.constant 0.000000e+00 : f32
    %13 = vector.broadcast %cst_7 : f32 to vector<1x128xf32>
    %14 = arith.maximumf %12, %13 : vector<1x128xf32>
    %c0_8 = arith.constant 0 : index
    %c0_9 = arith.constant 0 : index
    %15 = memref.load %arg3[%c0_8, %c0_9] : memref<1x10xf32, #tpu.memory_space<smem>>
    %16 = vector.broadcast %15 : f32 to vector<1x128xf32>
    %17 = arith.mulf %14, %16 : vector<1x128xf32>
    %18 = arith.addf %2, %17 : vector<1x128xf32>
    %c1_10 = arith.constant 1 : index
    %c0_11 = arith.constant 0 : index
    %19 = memref.load %arg1[%c1_10, %c0_11] : memref<10x2xf32, #tpu.memory_space<smem>>
    %20 = vector.broadcast %19 : f32 to vector<1x128xf32>
    %21 = arith.mulf %0, %20 : vector<1x128xf32>
    %c1_12 = arith.constant 1 : index
    %c1_13 = arith.constant 1 : index
    %22 = memref.load %arg1[%c1_12, %c1_13] : memref<10x2xf32, #tpu.memory_space<smem>>
    %23 = vector.broadcast %22 : f32 to vector<1x128xf32>
    %24 = arith.mulf %1, %23 : vector<1x128xf32>
    %25 = arith.addf %21, %24 : vector<1x128xf32>
    %c1_14 = arith.constant 1 : index
    %26 = memref.load %arg2[%c1_14] : memref<10xf32, #tpu.memory_space<smem>>
    %27 = vector.broadcast %26 : f32 to vector<1x128xf32>
    %28 = arith.addf %25, %27 : vector<1x128xf32>
    %cst_15 = arith.constant 0.000000e+00 : f32
    %29 = vector.broadcast %cst_15 : f32 to vector<1x128xf32>
    %30 = arith.maximumf %28, %29 : vector<1x128xf32>
    %c0_16 = arith.constant 0 : index
    %c1_17 = arith.constant 1 : index
    %31 = memref.load %arg3[%c0_16, %c1_17] : memref<1x10xf32, #tpu.memory_space<smem>>
    %32 = vector.broadcast %31 : f32 to vector<1x128xf32>
    %33 = arith.mulf %30, %32 : vector<1x128xf32>
    %34 = arith.addf %18, %33 : vector<1x128xf32>
    %c2 = arith.constant 2 : index
    %c0_18 = arith.constant 0 : index
    %35 = memref.load %arg1[%c2, %c0_18] : memref<10x2xf32, #tpu.memory_space<smem>>
    %36 = vector.broadcast %35 : f32 to vector<1x128xf32>
    %37 = arith.mulf %0, %36 : vector<1x128xf32>
    %c2_19 = arith.constant 2 : index
    %c1_20 = arith.constant 1 : index
    %38 = memref.load %arg1[%c2_19, %c1_20] : memref<10x2xf32, #tpu.memory_space<smem>>
    %39 = vector.broadcast %38 : f32 to vector<1x128xf32>
    %40 = arith.mulf %1, %39 : vector<1x128xf32>
    %41 = arith.addf %37, %40 : vector<1x128xf32>
    %c2_21 = arith.constant 2 : index
    %42 = memref.load %arg2[%c2_21] : memref<10xf32, #tpu.memory_space<smem>>
    %43 = vector.broadcast %42 : f32 to vector<1x128xf32>
    %44 = arith.addf %41, %43 : vector<1x128xf32>
    %cst_22 = arith.constant 0.000000e+00 : f32
    %45 = vector.broadcast %cst_22 : f32 to vector<1x128xf32>
    %46 = arith.maximumf %44, %45 : vector<1x128xf32>
    %c0_23 = arith.constant 0 : index
    %c2_24 = arith.constant 2 : index
    %47 = memref.load %arg3[%c0_23, %c2_24] : memref<1x10xf32, #tpu.memory_space<smem>>
    %48 = vector.broadcast %47 : f32 to vector<1x128xf32>
    %49 = arith.mulf %46, %48 : vector<1x128xf32>
    %50 = arith.addf %34, %49 : vector<1x128xf32>
    %c3 = arith.constant 3 : index
    %c0_25 = arith.constant 0 : index
    %51 = memref.load %arg1[%c3, %c0_25] : memref<10x2xf32, #tpu.memory_space<smem>>
    %52 = vector.broadcast %51 : f32 to vector<1x128xf32>
    %53 = arith.mulf %0, %52 : vector<1x128xf32>
    %c3_26 = arith.constant 3 : index
    %c1_27 = arith.constant 1 : index
    %54 = memref.load %arg1[%c3_26, %c1_27] : memref<10x2xf32, #tpu.memory_space<smem>>
    %55 = vector.broadcast %54 : f32 to vector<1x128xf32>
    %56 = arith.mulf %1, %55 : vector<1x128xf32>
    %57 = arith.addf %53, %56 : vector<1x128xf32>
    %c3_28 = arith.constant 3 : index
    %58 = memref.load %arg2[%c3_28] : memref<10xf32, #tpu.memory_space<smem>>
    %59 = vector.broadcast %58 : f32 to vector<1x128xf32>
    %60 = arith.addf %57, %59 : vector<1x128xf32>
    %cst_29 = arith.constant 0.000000e+00 : f32
    %61 = vector.broadcast %cst_29 : f32 to vector<1x128xf32>
    %62 = arith.maximumf %60, %61 : vector<1x128xf32>
    %c0_30 = arith.constant 0 : index
    %c3_31 = arith.constant 3 : index
    %63 = memref.load %arg3[%c0_30, %c3_31] : memref<1x10xf32, #tpu.memory_space<smem>>
    %64 = vector.broadcast %63 : f32 to vector<1x128xf32>
    %65 = arith.mulf %62, %64 : vector<1x128xf32>
    %66 = arith.addf %50, %65 : vector<1x128xf32>
    %c4 = arith.constant 4 : index
    %c0_32 = arith.constant 0 : index
    %67 = memref.load %arg1[%c4, %c0_32] : memref<10x2xf32, #tpu.memory_space<smem>>
    %68 = vector.broadcast %67 : f32 to vector<1x128xf32>
    %69 = arith.mulf %0, %68 : vector<1x128xf32>
    %c4_33 = arith.constant 4 : index
    %c1_34 = arith.constant 1 : index
    %70 = memref.load %arg1[%c4_33, %c1_34] : memref<10x2xf32, #tpu.memory_space<smem>>
    %71 = vector.broadcast %70 : f32 to vector<1x128xf32>
    %72 = arith.mulf %1, %71 : vector<1x128xf32>
    %73 = arith.addf %69, %72 : vector<1x128xf32>
    %c4_35 = arith.constant 4 : index
    %74 = memref.load %arg2[%c4_35] : memref<10xf32, #tpu.memory_space<smem>>
    %75 = vector.broadcast %74 : f32 to vector<1x128xf32>
    %76 = arith.addf %73, %75 : vector<1x128xf32>
    %cst_36 = arith.constant 0.000000e+00 : f32
    %77 = vector.broadcast %cst_36 : f32 to vector<1x128xf32>
    %78 = arith.maximumf %76, %77 : vector<1x128xf32>
    %c0_37 = arith.constant 0 : index
    %c4_38 = arith.constant 4 : index
    %79 = memref.load %arg3[%c0_37, %c4_38] : memref<1x10xf32, #tpu.memory_space<smem>>
    %80 = vector.broadcast %79 : f32 to vector<1x128xf32>
    %81 = arith.mulf %78, %80 : vector<1x128xf32>
    %82 = arith.addf %66, %81 : vector<1x128xf32>
    %c5 = arith.constant 5 : index
    %c0_39 = arith.constant 0 : index
    %83 = memref.load %arg1[%c5, %c0_39] : memref<10x2xf32, #tpu.memory_space<smem>>
    %84 = vector.broadcast %83 : f32 to vector<1x128xf32>
    %85 = arith.mulf %0, %84 : vector<1x128xf32>
    %c5_40 = arith.constant 5 : index
    %c1_41 = arith.constant 1 : index
    %86 = memref.load %arg1[%c5_40, %c1_41] : memref<10x2xf32, #tpu.memory_space<smem>>
    %87 = vector.broadcast %86 : f32 to vector<1x128xf32>
    %88 = arith.mulf %1, %87 : vector<1x128xf32>
    %89 = arith.addf %85, %88 : vector<1x128xf32>
    %c5_42 = arith.constant 5 : index
    %90 = memref.load %arg2[%c5_42] : memref<10xf32, #tpu.memory_space<smem>>
    %91 = vector.broadcast %90 : f32 to vector<1x128xf32>
    %92 = arith.addf %89, %91 : vector<1x128xf32>
    %cst_43 = arith.constant 0.000000e+00 : f32
    %93 = vector.broadcast %cst_43 : f32 to vector<1x128xf32>
    %94 = arith.maximumf %92, %93 : vector<1x128xf32>
    %c0_44 = arith.constant 0 : index
    %c5_45 = arith.constant 5 : index
    %95 = memref.load %arg3[%c0_44, %c5_45] : memref<1x10xf32, #tpu.memory_space<smem>>
    %96 = vector.broadcast %95 : f32 to vector<1x128xf32>
    %97 = arith.mulf %94, %96 : vector<1x128xf32>
    %98 = arith.addf %82, %97 : vector<1x128xf32>
    %c6 = arith.constant 6 : index
    %c0_46 = arith.constant 0 : index
    %99 = memref.load %arg1[%c6, %c0_46] : memref<10x2xf32, #tpu.memory_space<smem>>
    %100 = vector.broadcast %99 : f32 to vector<1x128xf32>
    %101 = arith.mulf %0, %100 : vector<1x128xf32>
    %c6_47 = arith.constant 6 : index
    %c1_48 = arith.constant 1 : index
    %102 = memref.load %arg1[%c6_47, %c1_48] : memref<10x2xf32, #tpu.memory_space<smem>>
    %103 = vector.broadcast %102 : f32 to vector<1x128xf32>
    %104 = arith.mulf %1, %103 : vector<1x128xf32>
    %105 = arith.addf %101, %104 : vector<1x128xf32>
    %c6_49 = arith.constant 6 : index
    %106 = memref.load %arg2[%c6_49] : memref<10xf32, #tpu.memory_space<smem>>
    %107 = vector.broadcast %106 : f32 to vector<1x128xf32>
    %108 = arith.addf %105, %107 : vector<1x128xf32>
    %cst_50 = arith.constant 0.000000e+00 : f32
    %109 = vector.broadcast %cst_50 : f32 to vector<1x128xf32>
    %110 = arith.maximumf %108, %109 : vector<1x128xf32>
    %c0_51 = arith.constant 0 : index
    %c6_52 = arith.constant 6 : index
    %111 = memref.load %arg3[%c0_51, %c6_52] : memref<1x10xf32, #tpu.memory_space<smem>>
    %112 = vector.broadcast %111 : f32 to vector<1x128xf32>
    %113 = arith.mulf %110, %112 : vector<1x128xf32>
    %114 = arith.addf %98, %113 : vector<1x128xf32>
    %c7 = arith.constant 7 : index
    %c0_53 = arith.constant 0 : index
    %115 = memref.load %arg1[%c7, %c0_53] : memref<10x2xf32, #tpu.memory_space<smem>>
    %116 = vector.broadcast %115 : f32 to vector<1x128xf32>
    %117 = arith.mulf %0, %116 : vector<1x128xf32>
    %c7_54 = arith.constant 7 : index
    %c1_55 = arith.constant 1 : index
    %118 = memref.load %arg1[%c7_54, %c1_55] : memref<10x2xf32, #tpu.memory_space<smem>>
    %119 = vector.broadcast %118 : f32 to vector<1x128xf32>
    %120 = arith.mulf %1, %119 : vector<1x128xf32>
    %121 = arith.addf %117, %120 : vector<1x128xf32>
    %c7_56 = arith.constant 7 : index
    %122 = memref.load %arg2[%c7_56] : memref<10xf32, #tpu.memory_space<smem>>
    %123 = vector.broadcast %122 : f32 to vector<1x128xf32>
    %124 = arith.addf %121, %123 : vector<1x128xf32>
    %cst_57 = arith.constant 0.000000e+00 : f32
    %125 = vector.broadcast %cst_57 : f32 to vector<1x128xf32>
    %126 = arith.maximumf %124, %125 : vector<1x128xf32>
    %c0_58 = arith.constant 0 : index
    %c7_59 = arith.constant 7 : index
    %127 = memref.load %arg3[%c0_58, %c7_59] : memref<1x10xf32, #tpu.memory_space<smem>>
    %128 = vector.broadcast %127 : f32 to vector<1x128xf32>
    %129 = arith.mulf %126, %128 : vector<1x128xf32>
    %130 = arith.addf %114, %129 : vector<1x128xf32>
    %c8 = arith.constant 8 : index
    %c0_60 = arith.constant 0 : index
    %131 = memref.load %arg1[%c8, %c0_60] : memref<10x2xf32, #tpu.memory_space<smem>>
    %132 = vector.broadcast %131 : f32 to vector<1x128xf32>
    %133 = arith.mulf %0, %132 : vector<1x128xf32>
    %c8_61 = arith.constant 8 : index
    %c1_62 = arith.constant 1 : index
    %134 = memref.load %arg1[%c8_61, %c1_62] : memref<10x2xf32, #tpu.memory_space<smem>>
    %135 = vector.broadcast %134 : f32 to vector<1x128xf32>
    %136 = arith.mulf %1, %135 : vector<1x128xf32>
    %137 = arith.addf %133, %136 : vector<1x128xf32>
    %c8_63 = arith.constant 8 : index
    %138 = memref.load %arg2[%c8_63] : memref<10xf32, #tpu.memory_space<smem>>
    %139 = vector.broadcast %138 : f32 to vector<1x128xf32>
    %140 = arith.addf %137, %139 : vector<1x128xf32>
    %cst_64 = arith.constant 0.000000e+00 : f32
    %141 = vector.broadcast %cst_64 : f32 to vector<1x128xf32>
    %142 = arith.maximumf %140, %141 : vector<1x128xf32>
    %c0_65 = arith.constant 0 : index
    %c8_66 = arith.constant 8 : index
    %143 = memref.load %arg3[%c0_65, %c8_66] : memref<1x10xf32, #tpu.memory_space<smem>>
    %144 = vector.broadcast %143 : f32 to vector<1x128xf32>
    %145 = arith.mulf %142, %144 : vector<1x128xf32>
    %146 = arith.addf %130, %145 : vector<1x128xf32>
    %c9 = arith.constant 9 : index
    %c0_67 = arith.constant 0 : index
    %147 = memref.load %arg1[%c9, %c0_67] : memref<10x2xf32, #tpu.memory_space<smem>>
    %148 = vector.broadcast %147 : f32 to vector<1x128xf32>
    %149 = arith.mulf %0, %148 : vector<1x128xf32>
    %c9_68 = arith.constant 9 : index
    %c1_69 = arith.constant 1 : index
    %150 = memref.load %arg1[%c9_68, %c1_69] : memref<10x2xf32, #tpu.memory_space<smem>>
    %151 = vector.broadcast %150 : f32 to vector<1x128xf32>
    %152 = arith.mulf %1, %151 : vector<1x128xf32>
    %153 = arith.addf %149, %152 : vector<1x128xf32>
    %c9_70 = arith.constant 9 : index
    %154 = memref.load %arg2[%c9_70] : memref<10xf32, #tpu.memory_space<smem>>
    %155 = vector.broadcast %154 : f32 to vector<1x128xf32>
    %156 = arith.addf %153, %155 : vector<1x128xf32>
    %cst_71 = arith.constant 0.000000e+00 : f32
    %157 = vector.broadcast %cst_71 : f32 to vector<1x128xf32>
    %158 = arith.maximumf %156, %157 : vector<1x128xf32>
    %c0_72 = arith.constant 0 : index
    %c9_73 = arith.constant 9 : index
    %159 = memref.load %arg3[%c0_72, %c9_73] : memref<1x10xf32, #tpu.memory_space<smem>>
    %160 = vector.broadcast %159 : f32 to vector<1x128xf32>
    %161 = arith.mulf %158, %160 : vector<1x128xf32>
    %162 = arith.addf %146, %161 : vector<1x128xf32>
    %c0_74 = arith.constant 0 : index
    %163 = memref.load %arg4[%c0_74] : memref<1xf32, #tpu.memory_space<smem>>
    %164 = vector.broadcast %163 : f32 to vector<1x128xf32>
    %165 = arith.addf %162, %164 : vector<1x128xf32>
    %166 = arith.negf %165 : vector<1x128xf32>
    %167 = math.exp %166 : vector<1x128xf32>
    %cst_75 = arith.constant 1.000000e+00 : f32
    %168 = vector.broadcast %cst_75 : f32 to vector<1x128xf32>
    %169 = arith.addf %168, %167 : vector<1x128xf32>
    %170 = arith.divf %168, %169 : vector<1x128xf32>
    %c0_76 = arith.constant 0 : index
    %c0_77 = arith.constant 0 : index
    %171 = vector.load %arg6[%c0_76, %c0_77] : memref<1x128xf32, #tpu.memory_space<vmem>>, vector<1x128xf32>
    tpu.vector_store %arg6[%c0_76, %c0_77], %170 {strides = array<i32>} : memref<1x128xf32, #tpu.memory_space<vmem>>, vector<1x128xf32>,
    return
  }
  func.func @transform_0(%arg0: i32) -> (i32, i32) {
    %c0_i32 = arith.constant 0 : i32
    %c0_i32_0 = arith.constant 0 : i32
    %c0_i32_1 = arith.constant 0 : i32
    return %c0_i32, %c0_i32_0 : i32, i32
  }
  func.func @transform_1(%arg0: i32) -> i32 {
    %c0_i32 = arith.constant 0 : i32
    %c0_i32_0 = arith.constant 0 : i32
    return %c0_i32 : i32
  }
  func.func @transform_2(%arg0: i32) -> (i32, i32) {
    %c0_i32 = arith.constant 0 : i32
    %c0_i32_0 = arith.constant 0 : i32
    %c0_i32_1 = arith.constant 0 : i32
    return %c0_i32, %c0_i32_0 : i32, i32
  }
  func.func @transform_3(%arg0: i32) -> i32 {
    %c0_i32 = arith.constant 0 : i32
    %c0_i32_0 = arith.constant 0 : i32
    return %c0_i32 : i32
  }
  func.func @transform_4(%arg0: i32) -> (i32, i32) {
    %c0_i32 = arith.constant 0 : i32
    %c0_i32_0 = arith.constant 0 : i32
    return %c0_i32, %arg0 : i32, i32
  }
  func.func @transform_5(%arg0: i32) -> (i32, i32) {
    %c0_i32 = arith.constant 0 : i32
    %c0_i32_0 = arith.constant 0 : i32
    return %c0_i32, %arg0 : i32, i32
  }
}

</mosaic_0001>

<bundles_post_ra>
// kernel: simple_mlp_forward.1
= control target key start
LH: loop header
LB: loop body
LE: loop exit
PB: predicated region body
PF: predicated region fallthrough
CT: control target
= control target key end

     0   :  { %11 = vsyncpa [#allocation4], 0  ;;  %s493_s0 = inlined_call_operand.vmem [shape: f32[10,2], index: 0, kind: input, shape index: {}]   ;;  %s494_s1 = inlined_call_operand.vmem [shape: f32[10], index: 1, kind: input, shape index: {}]   ;;  %s495_s2 = inlined_call_operand.vmem [shape: f32[1,10], index: 2, kind: input, shape index: {}]   ;;  %s496_s3 = inlined_call_operand.<no memory space> [shape: f32[1], index: 3, kind: input, shape index: {}]   ;;  %s497_s4 = inlined_call_operand.vmem [shape: f32[2,128], index: 4, kind: input, shape index: {}]   ;;  %s498_s5 = inlined_call_operand.vmem [shape: f32[1,128], index: 5, kind: output, shape index: {}]  }
   0x1   :  { %12 = vsyncpa [#allocation6], 0  ;;  %s31_s20 = sshll.u32 %s494_s1, 4  ;;  %s18_s23 = sshll.u32 %s493_s0, 4  ;;  %s32_s20 = int_to_ptr.vmem [resolvable:$true] %s31_s20  ;;  %s19_s23 = int_to_ptr.vmem [resolvable:$true] %s18_s23 }
   0x2   :  { %s274_s24 = scalar_lea.vmem %s32_s20, 16  ;;  %p279_p1 = scmp.lt.s32.totalorder %s32_s20, %s32_s20 }
   0x3   :  { %p275_p0 = scmp.ne.s32.totalorder %s32_s20, %s274_s24  ;;  %p280_p2 = scmp.lt.s32.totalorder %s274_s24, %s274_s24 }
   0x5   :  { %p281_p3 = por %p280_p2, %p279_p1 }
   0x7   :  { %p282_p4 = pnand %p281_p3, %p275_p0 }
   0x9   :  { %285 = shalt.err (!%p282_p4)
}
   0xa   :  { %s314_s25 = smov [#allocation5]   ;;  %s286_s26 = scalar_lea.vmem %s19_s23, 256 }
   0xb   :  { %34 = dma.vmem_to_smem %s32_s20, 16, %s314_s25, [#allocation6]  }
   0xc   :  { %p287_p5 = scmp.ne.s32.totalorder %s19_s23, %s286_s26  ;;  %p291_p6 = scmp.lt.s32.totalorder %s19_s23, %s19_s23 }
   0xd   :  { %p292_p7 = scmp.lt.s32.totalorder %s286_s26, %s286_s26 }
   0xf   :  { %p293_p8 = por %p292_p7, %p291_p6 }
  0x11   :  { %p294_p9 = pnand %p293_p8, %p287_p5 }
  0x13   :  { %297 = shalt.err (!%p294_p9)
}
  0x14   :  { %s315_s1 = smov [#allocation3]   ;;  %s316_s27 = smov 128  }
  0x15   :  { %s317_s0 = smov 8   ;;  %s41_s30 = sshll.u32 %s495_s2, 4  ;;  %s42_s30 = int_to_ptr.vmem [resolvable:$true] %s41_s30 }
  0x16   :  { %24 = dma.vmem_to_smem %s19_s23, 256, %s315_s1, [#allocation4], %s316_s27, %s316_s27, %s317_s0  }
  0x17   :  { %s298_s6 = scalar_lea.vmem %s42_s30, 16  ;;  %p303_p11 = scmp.lt.s32.totalorder %s42_s30, %s42_s30 }
  0x18   :  { %p299_p10 = scmp.ne.s32.totalorder %s42_s30, %s298_s6  ;;  %p304_p12 = scmp.lt.s32.totalorder %s298_s6, %s298_s6 }
  0x1a   :  { %p305_p13 = por %p304_p12, %p303_p11 }
  0x1c   :  { %p306_p0 = pnand %p305_p13, %p299_p10 }
  0x1e   :  { %309 = shalt.err (!%p306_p0)
}
  0x1f   :  { %s318_s7 = smov [#allocation7]  }
  0x20   :  { %44 = dma.vmem_to_smem %s42_s30, 16, %s318_s7, [#allocation6]  }
  0x21   :  { %310 = dma.done.wait [#allocation4], 256  }
  0x22   :  { %311 = vsyncadd [#allocation4], 4294967040 }
  0x23   :  { %312 = dma.done.wait [#allocation6], 32  }
  0x24   :  { %313 = vsyncadd [#allocation6], 4294967264 }
  0x25   :  { %58 = sfence }
  0x26   :  { %s61_s8 = sld [smem:[#allocation3]]  ;;  %s227_s9 = sld [smem:[#allocation3 + $0x1]]  ;;  %v367_v0 = vld [vmem:[%s497_s4] sm:$0x1]  ;;  %v374_v1 = vld [vmem:[%s497_s4 + $0x1] sm:$0x1] }
  0x27   :  { %s358_s10 = sld [smem:[#allocation5]]  ;;  %s229_s12 = sld [smem:[#allocation3 + $0x81]] }
  0x28   :  { %s360_s2 = sld [smem:[#allocation7]]  ;;  %s362_s13 = sld [smem:[#allocation5 + $0x1]] }
  0x29   :  { %s228_s11 = sld [smem:[#allocation3 + $0x80]]  ;;  %s369_s16 = sld [smem:[#allocation7 + $0x1]] }
  0x2a   :  { %s232_s17 = sld [smem:[#allocation3 + $0x100]]  ;;  %s233_s20 = sld [smem:[#allocation3 + $0x101]] }
  0x2b   :  { %s376_s21 = sld [smem:[#allocation5 + $0x2]]  ;;  %s378_s22 = sld [smem:[#allocation3 + $0x180]] }
  0x2c   :  { %v62_v2 = vstv %s61_s8  ;;  %v65_v4 = vstv %s227_s9  ;;  %s381_s23 = sld [smem:[#allocation3 + $0x181]]  ;;  %s383_s24 = sld [smem:[#allocation5 + $0x3]] }
  0x2d   :  { %v63_v3 = vmul.f32 %v62_v2, %v367_v0  ;;  %v66_v5 = vmul.f32 %v65_v4, %v374_v1  ;;  %s386_s25 = sld [smem:[#allocation7 + $0x2]]  ;;  %s388_s4 = sld [smem:[#allocation3 + $0x200]]  ;;  %v69_v7 = vstv %s358_s10  ;;  %v80_v9 = vstv %s229_s12 }
  0x2e   :  { %s392_s26 = sld [smem:[#allocation3 + $0x201]]  ;;  %s394_s1 = sld [smem:[#allocation5 + $0x4]]  ;;  %v81_v11 = vmul.f32 %v80_v9, %v374_v1  ;;  %v84_v13 = vstv %s362_s13  ;;  %v73_v17 = vstv %s360_s2 }
  0x2f   :  { %v77_v6 = vstv %s228_s11  ;;  %v67_v10 = vadd.f32 %v66_v5, %v63_v3  ;;  %s397_s27 = sld [smem:[#allocation3 + $0x280]]  ;;  %s401_s0 = sld [smem:[#allocation3 + $0x281]]  ;;  %v88_v20 = vstv %s369_s16 }
  0x30   :  { %v78_v8 = vmul.f32 %v77_v6, %v367_v0  ;;  %v92_v12 = vstv %s232_s17  ;;  %v95_v15 = vstv %s233_s20  ;;  %s405_s28 = sld [smem:[#allocation7 + $0x3]]  ;;  %s407_s29 = sld [smem:[#allocation5 + $0x5]] }
  0x31   :  { %v93_v14 = vmul.f32 %v92_v12, %v367_v0  ;;  %v70_v16 = vadd.f32 %v69_v7, %v67_v10  ;;  %v96_v19 = vmul.f32 %v95_v15, %v374_v1  ;;  %v99_v21 = vstv %s376_s21  ;;  %s413_s30 = sld [smem:[#allocation3 + $0x300]]  ;;  %s416_s6 = sld [smem:[#allocation7 + $0x4]] }
  0x32   :  { %v82_v18 = vadd.f32 %v81_v11, %v78_v8  ;;  %v107_v22 = vstv %s378_s22  ;;  %v110_v23 = vstv %s381_s23  ;;  %s418_s7 = sld [smem:[#allocation3 + $0x301]]  ;;  %v114_v29 = vstv %s383_s24  ;;  %s424_s8 = sld [smem:[#allocation7 + $0x5]] }
  0x33   :  { %v71_v24 = vmax.f32 %v70_v16, 0.0  ;;  %v97_v26 = vadd.f32 %v96_v19, %v93_v14  ;;  %v108_v27 = vmul.f32 %v107_v22, %v367_v0  ;;  %v111_v28 = vmul.f32 %v110_v23, %v374_v1  ;;  %s426_s9 = sld [smem:[#allocation5 + $0x6]]  ;;  %s429_s10 = sld [smem:[#allocation3 + $0x380]] }
  0x34   :  { %v85_v25 = vadd.f32 %v84_v13, %v82_v18  ;;  %v122_v30 = vstv %s388_s4  ;;  %v125_v31 = vstv %s392_s26  ;;  %s431_s2 = sld [smem:[#allocation3 + $0x381]]  ;;  %v103_v36 = vstv %s386_s25  ;;  %s438_s11 = sld [smem:[#allocation5 + $0x7]] }
  0x35   :  { %v74_v32 = vmul.f32 %v73_v17, %v71_v24  ;;  %v100_v34 = vadd.f32 %v99_v21, %v97_v26  ;;  %v123_v35 = vmul.f32 %v122_v30, %v367_v0  ;;  %v112_v37 = vadd.f32 %v111_v28, %v108_v27  ;;  %s440_s12 = sld [smem:[#allocation3 + $0x400]]  ;;  %s446_s13 = sld [smem:[#allocation7 + $0x6]] }
  0x36   :  { %v86_v33 = vmax.f32 %v85_v25, 0.0  ;;  %v126_v38 = vmul.f32 %v125_v31, %v374_v1  ;;  %v129_v39 = vstv %s394_s1  ;;  %v137_v42 = vstv %s397_s27  ;;  %s448_s14 = sld [smem:[#allocation3 + $0x401]]  ;;  %s451_s15 = sld [smem:[#allocation3 + $0x480]] }
  0x37   :  { %v101_v41 = vmax.f32 %v100_v34, 0.0  ;;  %v140_v43 = vstv %s401_s0  ;;  %v115_v44 = vadd.f32 %v114_v29, %v112_v37  ;;  %v138_v46 = vmul.f32 %v137_v42, %v367_v0  ;;  %s456_s16 = sld [smem:[#allocation5 + $0x8]]  ;;  %s458_s17 = sld [smem:[#allocation3 + $0x481]] }
  0x38   :  { %v89_v40 = vmul.f32 %v88_v20, %v86_v33  ;;  %v127_v45 = vadd.f32 %v126_v38, %v123_v35  ;;  %v141_v47 = vmul.f32 %v140_v43, %v374_v1  ;;  %v118_v50 = vstv %s405_s28  ;;  %s461_s18 = sld [smem:[#allocation7 + $0x7]]  ;;  %s467_s19 = sld [smem:[#allocation5 + $0x9]] }
  0x39   :  { %v104_v49 = vmul.f32 %v103_v36, %v101_v41  ;;  %v144_v51 = vstv %s407_s29  ;;  %v116_v52 = vmax.f32 %v115_v44, 0.0  ;;  %v152_v55 = vstv %s413_s30  ;;  %s473_s20 = sld [smem:[#allocation7 + $0x8]]  ;;  %s263_s21 = sld [smem:[#allocation7 + $0x9]] }
  0x3a   :  { %v90_v48 = vadd.f32 %v89_v40, %v74_v32  ;;  %v130_v53 = vadd.f32 %v129_v39, %v127_v45  ;;  %v142_v54 = vadd.f32 %v141_v47, %v138_v46  ;;  %v133_v57 = vstv %s416_s6 }
  0x3b   :  { %v153_v58 = vmul.f32 %v152_v55, %v367_v0  ;;  %v155_v59 = vstv %s418_s7  ;;  %v119_v60 = vmul.f32 %v118_v50, %v116_v52  ;;  %v148_v2 = vstv %s424_s8 }
  0x3c   :  { %v105_v56 = vadd.f32 %v104_v49, %v90_v48  ;;  %v131_v61 = vmax.f32 %v130_v53, 0.0  ;;  %v145_v62 = vadd.f32 %v144_v51, %v142_v54  ;;  %v156_v63 = vmul.f32 %v155_v59, %v374_v1 }
  0x3d   :  { %v159_v3 = vstv %s426_s9  ;;  %v167_v4 = vstv %s429_s10  ;;  %v170_v5 = vstv %s431_s2  ;;  %v174_v12 = vstv %s438_s11 }
  0x3e   :  { %v120_v6 = vadd.f32 %v119_v60, %v105_v56  ;;  %v134_v7 = vmul.f32 %v133_v57, %v131_v61  ;;  %v146_v8 = vmax.f32 %v145_v62, 0.0  ;;  %v157_v9 = vadd.f32 %v156_v63, %v153_v58 }
  0x3f   :  { %v168_v10 = vmul.f32 %v167_v4, %v367_v0  ;;  %v171_v11 = vmul.f32 %v170_v5, %v374_v1  ;;  %v182_v13 = vstv %s440_s12  ;;  %v163_v18 = vstv %s446_s13 }
  0x40   :  { %v135_v14 = vadd.f32 %v134_v7, %v120_v6  ;;  %v149_v15 = vmul.f32 %v148_v2, %v146_v8  ;;  %v160_v16 = vadd.f32 %v159_v3, %v157_v9  ;;  %v183_v17 = vmul.f32 %v182_v13, %v367_v0 }
  0x41   :  { %v172_v19 = vadd.f32 %v171_v11, %v168_v10  ;;  %v185_v20 = vstv %s448_s14  ;;  %v197_v24 = vstv %s451_s15  ;;  %v189_v26 = vstv %s456_s16 }
  0x42   :  { %v150_v21 = vadd.f32 %v149_v15, %v135_v14  ;;  %v161_v22 = vmax.f32 %v160_v16, 0.0  ;;  %v186_v23 = vmul.f32 %v185_v20, %v374_v1  ;;  %v198_v27 = vmul.f32 %v197_v24, %v367_v0 }
  0x43   :  { %v175_v25 = vadd.f32 %v174_v12, %v172_v19  ;;  %v200_v28 = vstv %s458_s17  ;;  %v178_v30 = vstv %s461_s18  ;;  %v204_v34 = vstv %s467_s19 }
  0x44   :  { %v164_v29 = vmul.f32 %v163_v18, %v161_v22  ;;  %v187_v31 = vadd.f32 %v186_v23, %v183_v17  ;;  %v201_v32 = vmul.f32 %v200_v28, %v374_v1  ;;  %v193_v39 = vstv %s473_s20 }
  0x45   :  { %v176_v33 = vmax.f32 %v175_v25, 0.0  ;;  %v208_v43 = vstv %s263_s21  ;;  %v212_v47 = vstv %s496_s3 }
  0x46   :  { %v165_v35 = vadd.f32 %v164_v29, %v150_v21  ;;  %v190_v36 = vadd.f32 %v189_v26, %v187_v31  ;;  %v202_v37 = vadd.f32 %v201_v32, %v198_v27 }
  0x47   :  { %v179_v38 = vmul.f32 %v178_v30, %v176_v33 }
  0x48   :  { %v191_v40 = vmax.f32 %v190_v36, 0.0  ;;  %v205_v41 = vadd.f32 %v204_v34, %v202_v37 }
  0x49   :  { %v180_v42 = vadd.f32 %v179_v38, %v165_v35 }
  0x4a   :  { %v194_v44 = vmul.f32 %v193_v39, %v191_v40  ;;  %v206_v45 = vmax.f32 %v205_v41, 0.0 }
  0x4c   :  { %v195_v0 = vadd.f32 %v194_v44, %v180_v42  ;;  %v209_v46 = vmul.f32 %v208_v43, %v206_v45 }
  0x4e   :  { %v210_v1 = vadd.f32 %v209_v46, %v195_v0 }
  0x50   :  { %v213_v48 = vadd.f32 %v212_v47, %v210_v1 }
  0x52   :  { %v264_v49 = vmul.f32 -1.442695, %v213_v48 }
  0x54   :  { %270 = vpow2.f32 %v264_v49 }
  0x5e   :  { %v271_v50 = vpop.eup %270 }
  0x5f   :  { %v217_v51 = vadd.f32 1.0, %v271_v50 }
  0x61   :  { %272 = vrcp.f32 %v217_v51 }
  0x6b   :  { %v273_v52 = vpop.eup %272 }
  0x6c   :  { %220 = vst [vmem:[%s498_s5] sm:$0x1] %v273_v52 }
  0x6d   :  { %225 = vsyncpa [#allocation4], 1 }
  0x6e   :  { %226 = vsyncpa [#allocation6], 1 }

</bundles_post_ra>
